<compile_context>
chip_gen: v6e
topology: v6e:2x2x1
jax: 0.10.0
libtpu: 0.0.40
codegen_flags: <defaults>
</compile_context>

<pallas_src>
import jax
import jax.numpy as jnp
from jax import lax
from jax.experimental import pallas as pl
from jax.experimental.pallas import tpu as pltpu


def _downsample_kernel(e0_ref, o0_ref, e1_ref, o1_ref, e2_ref, o2_ref,
                       w_ref, b_ref, out_ref):
    # e{k}_ref / o{k}_ref: (1, 1, We, C) even-/odd-column halves of padded input
    #                      row 2*ho + k (k = kernel row index 0..2)
    # w_ref:  (9*C, C)  im2col weight matrix, (kh, kw, cin)-major
    # b_ref:  (1, C)    bias
    # out_ref:(1, 1, Wo, C) one output row of the conv
    Wo = out_ref.shape[2]

    taps = []
    for e_ref, o_ref in ((e0_ref, o0_ref), (e1_ref, o1_ref), (e2_ref, o2_ref)):
        e = e_ref[0, 0]                                    # (We, C) even padded cols
        o = o_ref[0, 0]                                    # (We, C) odd padded cols
        # kw = 0 -> padded col 2*wo     -> even[wo]
        # kw = 1 -> padded col 2*wo + 1 -> odd[wo]
        # kw = 2 -> padded col 2*wo + 2 -> even[wo + 1]
        taps += [e[:Wo, :], o[:Wo, :], e[1:Wo + 1, :]]

    patches = jnp.concatenate(taps, axis=-1)               # (Wo, 9*C) im2col rows
    acc = jnp.dot(patches, w_ref[...],
                  preferred_element_type=jnp.float32)      # single fused MXU matmul
    acc = acc + b_ref[...]                                 # (1, C) broadcast bias
    out_ref[...] = acc.reshape(out_ref.shape).astype(out_ref.dtype)


def downsample_pallas(x_nchw, w_oihw, bias):
    """Conv2d(dim, dim, 3, stride=2, padding=1) forward. x_nchw: (N, C, H, W)."""
    N, C, H, W = x_nchw.shape
    Ho = (H + 2 - 3) // 2 + 1
    Wo = (W + 2 - 3) // 2 + 1

    # ---- glue (plain JAX): layout conversion, padding, parity split, weight reshape ----
    x = jnp.transpose(x_nchw, (0, 2, 3, 1))                # (N, H, W, C)
    xp = jnp.pad(x, ((0, 0), (1, 1), (1, 1), (0, 0)))      # (N, H+2, W+2, C)
    Hp, Wp = H + 2, W + 2
    if Wp % 2:                                             # make width even so halves match
        xp = jnp.pad(xp, ((0, 0), (0, 0), (0, 1), (0, 0)))
        Wp += 1
    We = Wp // 2
    # Parity split along W: every 3x3/stride-2 tap becomes a contiguous window of
    # one of these two arrays (total size ~= padded input; no 9x tap blow-up).
    x_even = xp[:, :, 0::2, :]                             # (N, Hp, We, C)
    x_odd = xp[:, :, 1::2, :]                              # (N, Hp, We, C)

    # (O, I, 3, 3) -> (kh, kw, Cin, Cout) -> (9*Cin, Cout); matches in-kernel tap order.
    w_flat = jnp.transpose(w_oihw, (2, 3, 1, 0)).reshape(9 * C, C)
    b2 = bias.reshape(1, C)

    row_block = (1, 1, We, C)

    def row_spec(kh):
        # Block size 1 along H, so the returned "block index" 2*ho + kh is an
        # element offset: data-dependent-free strided tap access via index_map.
        return pl.BlockSpec(row_block, lambda n, ho, kh=kh: (n, 2 * ho + kh, 0, 0))

    out_nhwc = pl.pallas_call(
        _downsample_kernel,
        out_shape=jax.ShapeDtypeStruct((N, Ho, Wo, C), x_nchw.dtype),
        grid=(N, Ho),
        in_specs=[
            row_spec(0), row_spec(0),      # even / odd halves of padded row 2*ho
            row_spec(1), row_spec(1),      # even / odd halves of padded row 2*ho + 1
            row_spec(2), row_spec(2),      # even / odd halves of padded row 2*ho + 2
            pl.BlockSpec((9 * C, C), lambda n, ho: (0, 0)),   # weights: whole block
            pl.BlockSpec((1, C), lambda n, ho: (0, 0)),       # bias: whole block
        ],
        out_specs=pl.BlockSpec((1, 1, Wo, C), lambda n, ho: (n, ho, 0, 0)),
        compiler_params=pltpu.CompilerParams(
            dimension_semantics=("parallel", "parallel")),
    )(x_even, x_odd, x_even, x_odd, x_even, x_odd, w_flat, b2)

    return jnp.transpose(out_nhwc, (0, 3, 1, 2))           # back to NCHW


if __name__ == "__main__":
    key = jax.random.PRNGKey(0)
    k_x, k_w, k_b = jax.random.split(key, 3)

    N, C, H, W = 2, 4, 16, 16
    x = jax.random.normal(k_x, (N, C, H, W), dtype=jnp.float32)

    # Deterministic Conv2d-style init (uniform in +/- 1/sqrt(fan_in), fan_in = C*3*3)
    fan_in = C * 3 * 3
    bound = 1.0 / (fan_in ** 0.5)
    w = jax.random.uniform(k_w, (C, C, 3, 3), jnp.float32, -bound, bound)  # (O, I, kH, kW)
    b = jax.random.uniform(k_b, (C,), jnp.float32, -bound, bound)

    out = downsample_pallas(x, w, b)
    out = jax.block_until_ready(out)

    # Reference: XLA conv with identical semantics (NCHW, stride 2, pad 1).
    ref = lax.conv_general_dilated(
        x, w, window_strides=(2, 2), padding=((1, 1), (1, 1)),
        dimension_numbers=("NCHW", "OIHW", "NCHW"),
    ) + b.reshape(1, C, 1, 1)

    assert out.shape == (N, C, H // 2, W // 2), out.shape
    # f32 everywhere; tolerance allows for the different summation association of
    # the single fused im2col matmul vs. the XLA conv.
    assert jnp.allclose(out, ref, atol=1e-4, rtol=1e-4), float(jnp.max(jnp.abs(out - ref)))

    print("KERNEL_OK")
</pallas_src>

<mosaic_0001>
module attributes {stable_mosaic.version = 11 : i64} {
  func.func @_downsample_kernel(%arg0: i32, %arg1: i32, %arg2: memref<1x1x9x4xf32, #tpu.memory_space<vmem>>, %arg3: memref<1x1x9x4xf32, #tpu.memory_space<vmem>>, %arg4: memref<1x1x9x4xf32, #tpu.memory_space<vmem>>, %arg5: memref<1x1x9x4xf32, #tpu.memory_space<vmem>>, %arg6: memref<1x1x9x4xf32, #tpu.memory_space<vmem>>, %arg7: memref<1x1x9x4xf32, #tpu.memory_space<vmem>>, %arg8: memref<36x4xf32, #tpu.memory_space<vmem>>, %arg9: memref<1x4xf32, #tpu.memory_space<vmem>>, %arg10: memref<1x1x8x4xf32, #tpu.memory_space<vmem>>) attributes {dimension_semantics = [#tpu.dimension_semantics<parallel>, #tpu.dimension_semantics<parallel>], iteration_bounds = array<i64: 2, 8>, scalar_prefetch = 0 : i64, scratch_operands = 0 : i64, tpu.core_type = #tpu.core_type<tc>, window_params = [{transform_indices = @transform_0, window_bounds = array<i64: 1, 1, 9, 4>}, {transform_indices = @transform_1, window_bounds = array<i64: 1, 1, 9, 4>}, {transform_indices = @transform_2, window_bounds = array<i64: 1, 1, 9, 4>}, {transform_indices = @transform_3, window_bounds = array<i64: 1, 1, 9, 4>}, {transform_indices = @transform_4, window_bounds = array<i64: 1, 1, 9, 4>}, {transform_indices = @transform_5, window_bounds = array<i64: 1, 1, 9, 4>}, {pipeline_mode = #tpu.pipeline_mode<synchronous>, transform_indices = @transform_6, window_bounds = array<i64: 36, 4>}, {pipeline_mode = #tpu.pipeline_mode<synchronous>, transform_indices = @transform_7, window_bounds = array<i64: 1, 4>}, {transform_indices = @transform_8, window_bounds = array<i64: 1, 1, 8, 4>}]} {
    %c0 = arith.constant 0 : index
    %c0_0 = arith.constant 0 : index
    %c0_1 = arith.constant 0 : index
    %c0_2 = arith.constant 0 : index
    %0 = vector.load %arg2[%c0, %c0_0, %c0_1, %c0_2] : memref<1x1x9x4xf32, #tpu.memory_space<vmem>>, vector<1x1x9x4xf32>
    %1 = vector.shape_cast %0 : vector<1x1x9x4xf32> to vector<9x4xf32>
    %c0_3 = arith.constant 0 : index
    %c0_4 = arith.constant 0 : index
    %c0_5 = arith.constant 0 : index
    %c0_6 = arith.constant 0 : index
    %2 = vector.load %arg3[%c0_3, %c0_4, %c0_5, %c0_6] : memref<1x1x9x4xf32, #tpu.memory_space<vmem>>, vector<1x1x9x4xf32>
    %3 = vector.shape_cast %2 : vector<1x1x9x4xf32> to vector<9x4xf32>
    %4 = vector.extract_strided_slice %1 {offsets = [0, 0], sizes = [8, 4], strides = [1, 1]} : vector<9x4xf32> to vector<8x4xf32>
    %5 = vector.extract_strided_slice %3 {offsets = [0, 0], sizes = [8, 4], strides = [1, 1]} : vector<9x4xf32> to vector<8x4xf32>
    %6 = vector.extract_strided_slice %1 {offsets = [1, 0], sizes = [8, 4], strides = [1, 1]} : vector<9x4xf32> to vector<8x4xf32>
    %c0_7 = arith.constant 0 : index
    %c0_8 = arith.constant 0 : index
    %c0_9 = arith.constant 0 : index
    %c0_10 = arith.constant 0 : index
    %7 = vector.load %arg4[%c0_7, %c0_8, %c0_9, %c0_10] : memref<1x1x9x4xf32, #tpu.memory_space<vmem>>, vector<1x1x9x4xf32>
    %8 = vector.shape_cast %7 : vector<1x1x9x4xf32> to vector<9x4xf32>
    %c0_11 = arith.constant 0 : index
    %c0_12 = arith.constant 0 : index
    %c0_13 = arith.constant 0 : index
    %c0_14 = arith.constant 0 : index
    %9 = vector.load %arg5[%c0_11, %c0_12, %c0_13, %c0_14] : memref<1x1x9x4xf32, #tpu.memory_space<vmem>>, vector<1x1x9x4xf32>
    %10 = vector.shape_cast %9 : vector<1x1x9x4xf32> to vector<9x4xf32>
    %11 = vector.extract_strided_slice %8 {offsets = [0, 0], sizes = [8, 4], strides = [1, 1]} : vector<9x4xf32> to vector<8x4xf32>
    %12 = vector.extract_strided_slice %10 {offsets = [0, 0], sizes = [8, 4], strides = [1, 1]} : vector<9x4xf32> to vector<8x4xf32>
    %13 = vector.extract_strided_slice %8 {offsets = [1, 0], sizes = [8, 4], strides = [1, 1]} : vector<9x4xf32> to vector<8x4xf32>
    %c0_15 = arith.constant 0 : index
    %c0_16 = arith.constant 0 : index
    %c0_17 = arith.constant 0 : index
    %c0_18 = arith.constant 0 : index
    %14 = vector.load %arg6[%c0_15, %c0_16, %c0_17, %c0_18] : memref<1x1x9x4xf32, #tpu.memory_space<vmem>>, vector<1x1x9x4xf32>
    %15 = vector.shape_cast %14 : vector<1x1x9x4xf32> to vector<9x4xf32>
    %c0_19 = arith.constant 0 : index
    %c0_20 = arith.constant 0 : index
    %c0_21 = arith.constant 0 : index
    %c0_22 = arith.constant 0 : index
    %16 = vector.load %arg7[%c0_19, %c0_20, %c0_21, %c0_22] : memref<1x1x9x4xf32, #tpu.memory_space<vmem>>, vector<1x1x9x4xf32>
    %17 = vector.shape_cast %16 : vector<1x1x9x4xf32> to vector<9x4xf32>
    %18 = vector.extract_strided_slice %15 {offsets = [0, 0], sizes = [8, 4], strides = [1, 1]} : vector<9x4xf32> to vector<8x4xf32>
    %19 = vector.extract_strided_slice %17 {offsets = [0, 0], sizes = [8, 4], strides = [1, 1]} : vector<9x4xf32> to vector<8x4xf32>
    %20 = vector.extract_strided_slice %15 {offsets = [1, 0], sizes = [8, 4], strides = [1, 1]} : vector<9x4xf32> to vector<8x4xf32>
    %21 = tpu.concatenate %4, %5, %6, %11, %12, %13, %18, %19, %20 in 1 : vector<8x4xf32>, vector<8x4xf32>, vector<8x4xf32>, vector<8x4xf32>, vector<8x4xf32>, vector<8x4xf32>, vector<8x4xf32>, vector<8x4xf32>, vector<8x4xf32> -> vector<8x36xf32>
    %c0_23 = arith.constant 0 : index
    %c0_24 = arith.constant 0 : index
    %22 = vector.load %arg8[%c0_23, %c0_24] : memref<36x4xf32, #tpu.memory_space<vmem>>, vector<36x4xf32>
    %cst = arith.constant dense<0.000000e+00> : vector<8x4xf32>
    %23 = tpu.matmul %21, %22, %cst {dimension_numbers = #tpu.dot_dimension_numbers<[1], [0], [0], [1], [0, 0, 1, 1], [], []>} : vector<8x36xf32>, vector<36x4xf32>, vector<8x4xf32> -> vector<8x4xf32>
    %c0_25 = arith.constant 0 : index
    %c0_26 = arith.constant 0 : index
    %24 = vector.load %arg9[%c0_25, %c0_26] : memref<1x4xf32, #tpu.memory_space<vmem>>, vector<1x4xf32>
    %25 = vector.broadcast %24 : vector<1x4xf32> to vector<8x4xf32>
    %26 = arith.addf %23, %25 : vector<8x4xf32>
    %27 = vector.shape_cast %26 : vector<8x4xf32> to vector<1x1x8x4xf32>
    %c0_27 = arith.constant 0 : index
    %c0_28 = arith.constant 0 : index
    %c0_29 = arith.constant 0 : index
    %c0_30 = arith.constant 0 : index
    %28 = vector.load %arg10[%c0_27, %c0_28, %c0_29, %c0_30] : memref<1x1x8x4xf32, #tpu.memory_space<vmem>>, vector<1x1x8x4xf32>
    tpu.vector_store %arg10[%c0_27, %c0_28, %c0_29, %c0_30], %27 {strides = array<i32>} : memref<1x1x8x4xf32, #tpu.memory_space<vmem>>, vector<1x1x8x4xf32>,
    return
  }
  func.func @transform_0(%arg0: i32, %arg1: i32) -> (i32, i32, i32, i32) {
    %c2_i32 = arith.constant 2 : i32
    %0 = arith.muli %c2_i32, %arg1 : i32
    %c0_i32 = arith.constant 0 : i32
    %1 = arith.addi %0, %c0_i32 : i32
    %c0_i32_0 = arith.constant 0 : i32
    %c0_i32_1 = arith.constant 0 : i32
    %c0_i32_2 = arith.constant 0 : i32
    return %arg0, %1, %c0_i32_0, %c0_i32_1 : i32, i32, i32, i32
  }
  func.func @transform_1(%arg0: i32, %arg1: i32) -> (i32, i32, i32, i32) {
    %c2_i32 = arith.constant 2 : i32
    %0 = arith.muli %c2_i32, %arg1 : i32
    %c0_i32 = arith.constant 0 : i32
    %1 = arith.addi %0, %c0_i32 : i32
    %c0_i32_0 = arith.constant 0 : i32
    %c0_i32_1 = arith.constant 0 : i32
    %c0_i32_2 = arith.constant 0 : i32
    return %arg0, %1, %c0_i32_0, %c0_i32_1 : i32, i32, i32, i32
  }
  func.func @transform_2(%arg0: i32, %arg1: i32) -> (i32, i32, i32, i32) {
    %c2_i32 = arith.constant 2 : i32
    %0 = arith.muli %c2_i32, %arg1 : i32
    %c1_i32 = arith.constant 1 : i32
    %1 = arith.addi %0, %c1_i32 : i32
    %c0_i32 = arith.constant 0 : i32
    %c0_i32_0 = arith.constant 0 : i32
    %c0_i32_1 = arith.constant 0 : i32
    return %arg0, %1, %c0_i32, %c0_i32_0 : i32, i32, i32, i32
  }
  func.func @transform_3(%arg0: i32, %arg1: i32) -> (i32, i32, i32, i32) {
    %c2_i32 = arith.constant 2 : i32
    %0 = arith.muli %c2_i32, %arg1 : i32
    %c1_i32 = arith.constant 1 : i32
    %1 = arith.addi %0, %c1_i32 : i32
    %c0_i32 = arith.constant 0 : i32
    %c0_i32_0 = arith.constant 0 : i32
    %c0_i32_1 = arith.constant 0 : i32
    return %arg0, %1, %c0_i32, %c0_i32_0 : i32, i32, i32, i32
  }
  func.func @transform_4(%arg0: i32, %arg1: i32) -> (i32, i32, i32, i32) {
    %c2_i32 = arith.constant 2 : i32
    %0 = arith.muli %c2_i32, %arg1 : i32
    %c2_i32_0 = arith.constant 2 : i32
    %1 = arith.addi %0, %c2_i32_0 : i32
    %c0_i32 = arith.constant 0 : i32
    %c0_i32_1 = arith.constant 0 : i32
    %c0_i32_2 = arith.constant 0 : i32
    return %arg0, %1, %c0_i32, %c0_i32_1 : i32, i32, i32, i32
  }
  func.func @transform_5(%arg0: i32, %arg1: i32) -> (i32, i32, i32, i32) {
    %c2_i32 = arith.constant 2 : i32
    %0 = arith.muli %c2_i32, %arg1 : i32
    %c2_i32_0 = arith.constant 2 : i32
    %1 = arith.addi %0, %c2_i32_0 : i32
    %c0_i32 = arith.constant 0 : i32
    %c0_i32_1 = arith.constant 0 : i32
    %c0_i32_2 = arith.constant 0 : i32
    return %arg0, %1, %c0_i32, %c0_i32_1 : i32, i32, i32, i32
  }
  func.func @transform_6(%arg0: i32, %arg1: i32) -> (i32, i32) {
    %c0_i32 = arith.constant 0 : i32
    %c0_i32_0 = arith.constant 0 : i32
    %c0_i32_1 = arith.constant 0 : i32
    return %c0_i32, %c0_i32_0 : i32, i32
  }
  func.func @transform_7(%arg0: i32, %arg1: i32) -> (i32, i32) {
    %c0_i32 = arith.constant 0 : i32
    %c0_i32_0 = arith.constant 0 : i32
    %c0_i32_1 = arith.constant 0 : i32
    return %c0_i32, %c0_i32_0 : i32, i32
  }
  func.func @transform_8(%arg0: i32, %arg1: i32) -> (i32, i32, i32, i32) {
    %c0_i32 = arith.constant 0 : i32
    %c0_i32_0 = arith.constant 0 : i32
    %c0_i32_1 = arith.constant 0 : i32
    return %arg0, %arg1, %c0_i32, %c0_i32_0 : i32, i32, i32, i32
  }
}

</mosaic_0001>

<bundles_post_ra>
// kernel: tpu_custom_call.1
= control target key start
LH: loop header
LB: loop body
LE: loop exit
PB: predicated region body
PF: predicated region fallthrough
CT: control target
= control target key end

     0   :  { %s1140_s27 = smov 0   ;;  %s1142_s28 = smov 0   ;;  %s1253_s0 = inlined_call_operand.vmem [shape: f32[2,18,9,4], index: 0, kind: input, shape index: {}]   ;;  %s1254_s1 = inlined_call_operand.vmem [shape: f32[2,18,9,4], index: 1, kind: input, shape index: {}]   ;;  %s1255_s2 = inlined_call_operand.vmem [shape: f32[2,18,9,4], index: 2, kind: input, shape index: {}]   ;;  %s1256_s3 = inlined_call_operand.vmem [shape: f32[2,18,9,4], index: 3, kind: input, shape index: {}]   ;;  %s1257_s4 = inlined_call_operand.vmem [shape: f32[2,18,9,4], index: 4, kind: input, shape index: {}]   ;;  %s1258_s5 = inlined_call_operand.vmem [shape: f32[2,18,9,4], index: 5, kind: input, shape index: {}]   ;;  %s1259_s6 = inlined_call_operand.vmem [shape: f32[36,4], index: 6, kind: input, shape index: {}]   ;;  %s1260_s7 = inlined_call_operand.vmem [shape: f32[1,4], index: 7, kind: input, shape index: {}]   ;;  %s1261_s8 = inlined_call_operand.vmem [shape: f32[2,8,8,4], index: 8, kind: output, shape index: {}]  }
   0x1   :  { %s1144_s29 = smov 0   ;;  %s1146_s30 = smov 0  }
   0x2   :  { %s1148_s9 = smov 0  }
   0x3 LB: > { %s27_s10 = sadd.s32 1, %s1075_s29  ;;  %s30_s11 = sadd.s32 1, %s1079_s30  ;;  %s1083_s9 = sphi %s1148_s9, %s18_s9   ;;  %s1079_s30 = sphi %s1146_s30, %s1267_s30   ;;  %s1075_s29 = sphi %s1144_s29, %s1266_s29   ;;  %s1071_s28 = sphi %s1142_s28, %s1265_s28   ;;  %s1067_s27 = sphi %s1140_s27, %s1264_s27  }
   0x4   : > { %p28_p0 = scmp.ge.s32.totalorder %s27_s10, 8  ;;  %p949_p1 = scmp.ge.s32.totalorder %s1083_s9, 1 }
   0x5   : > { %p402_p2 = scmp.lt.s32.totalorder %s1083_s9, 17 }
   0x6   : > { %s1269_s10 = smov (%p28_p0, %s27_s10), 0  ;;  %s1271_s11 = smov (!%p28_p0, %s30_s11), %s1079_s30 }
   0x7   : > { %p403_p3 = pnand %p949_p1, %p402_p2  ;;  %p32_p4 = scmp.ge.s32.totalorder %s1271_s11, 2 }
   0x8   : > { %s1173_s12 = sshll.u32 (!%p403_p3), %s1067_s27, 1  ;;  %p499_p5 = scmp.lt.s32.totalorder (!%p403_p3), %s1071_s28, 1 }
   0x9   : > { %s1273_s11 = smov (%p32_p4, %s1271_s11), 0  ;;  %406 = sbr.rel (%p403_p3) target bundleno = 348 (0x15c), region = 52 }
   0xa   : > { %1262 = sst [smem:[#allocation2_spill]] %s1273_s11  ;;  %p501_p6 = scmp.lt.s32.totalorder (!%p403_p3), %s1173_s12, 17 }
   0xb   : > { %s521_s15 = sadd.s32 (!%p403_p3), 1, %s1173_s12  ;;  %s547_s19 = sadd.s32 (!%p403_p3), 2, %s1173_s12 }
   0xc   : > { %p524_p7 = scmp.lt.s32.totalorder (!%p403_p3), %s521_s15, 17  ;;  %p550_p8 = scmp.lt.s32.totalorder (!%p403_p3), %s547_s19, 17 }
   0xd   : > { %s1091_s24 = smov (!%p403_p3), 16   ;;  %p574_p9 = scmp.lt.s32.totalorder (!%p403_p3), %s1067_s27, 7 }
   0xe   : > { %s1275_s28 = smov (!%p499_p5, %s1071_s28), 1  ;;  %v1085_v0 = vmov 0.0   ;;  %v652_v1 = vld [vmem:[%s1259_s6 + $0x20] sm:$0xf]  ;;  %vm664_vm0 = vcmask 1043456   ;;  %v651_v2 = vld [vmem:[%s1259_s6 + $0x18] sm:$0xff] }
   0xf   : > { %s502_s13 = scalar_select %p501_p6, %s1173_s12, 17  ;;  %981 = vmatprep.subr.mxu0 %v1085_v0  ;;  %vm595_vm1 = vcmask 1046528   ;;  %v650_v8 = vld [vmem:[%s1259_s6 + $0x10] sm:$0xff]  ;;  %v649_v9 = vld [vmem:[%s1259_s6 + $0x8] sm:$0xff]  ;;  %v648_v11 = vld [vmem:[%s1259_s6] sm:$0xff]  ;;  %vm1088_vm2 = vmmov 0  }
  0x10   : > { %s1180_s14 = smul.u32 36, %s1275_s28  ;;  %982 = vmatpush3.msk.msra.mxu0 %vm664_vm0, %v652_v1  ;;  %s1277_s15 = smov (!%p524_p7, %s521_s15), 17  ;;  %991 = vmatprep.mubr.msk.f32.mxu0 %vm1088_vm2, %v1085_v0  ;;  %vm632_vm3 = vcmask 31744   ;;  %vm634_vm4 = vcmask 64512   ;;  %vm636_vm5 = vcmask 97280   ;;  %vm638_vm6 = vcmask 130048  }
  0x11   : > { %s951_s16 = sshll.u32 %s502_s13, 1  ;;  %983 = vmatprep.subr.mxu0 %v1085_v0  ;;  %s957_s11 = sshll.u32 %s1277_s15, 1  ;;  %vm640_vm7 = vcmask 162816   ;;  %vm642_vm8 = vcmask 195584   ;;  %vm644_vm9 = vcmask 228352   ;;  %vm646_vm10 = vcmask 261120  }
  0x12   : > { %s505_s17 = sadd.s32 %s1180_s14, %s951_s16  ;;  %984 = vmatpush3.msra.mxu0 %v651_v2  ;;  %s1086_s16 = smov 4   ;;  %vm660_vm11 = vcmask 293888   ;;  %v970_v40 = vld [vmem:[%s1260_s7] ss:$0 sm:$0xff] }
  0x13   : > { %s952_s20 = sshll.u32 %s505_s17, 3  ;;  %985 = vmatprep.subr.mxu0 %v1085_v0  ;;  %s528_s22 = sadd.s32 %s1180_s14, %s957_s11 }
  0x14   : > { %s518_s25 = scalar_lea.vmem %s1254_s1, %s952_s20  ;;  %s507_s13 = scalar_lea.vmem %s1253_s0, %s952_s20  ;;  %986 = vmatpush3.msra.mxu0 %v650_v8 }
  0x15   : > { %v582_v3 = vld [vmem:[%s518_s25] sm:$0xff]  ;;  %v581_v5 = vld [vmem:[%s507_s13 + $0x8] sm:$0x1]  ;;  %987 = vmatprep.subr.mxu0 %v1085_v0  ;;  %s958_s23 = sshll.u32 %s528_s22, 3  ;;  %s1279_s19 = smov (!%p550_p8, %s547_s19), 17 }
  0x16   : > { %v1196_v4 = vld [vmem:[%s507_s13] sm:$0xff]  ;;  %590 = vrot.lane.b32.xlu0 %v582_v3, %s1086_s16  ;;  %v597_v7 = vrot.slane %v581_v5, 1  ;;  %988 = vmatpush3.msra.mxu0 %v649_v9  ;;  %s530_s26 = scalar_lea.vmem %s1255_s2, %s958_s23  ;;  %s1087_s13 = smov 8  }
  0x17   : > { %v596_v6 = vrot.slane %v1196_v4, 1  ;;  %s543_s16 = scalar_lea.vmem %s1256_s3, %s958_s23  ;;  %989 = vmatprep.subr.mxu0 %v1085_v0  ;;  %v583_v12 = vld [vmem:[%s530_s26] sm:$0xff]  ;;  %v584_v13 = vld [vmem:[%s530_s26 + $0x8] sm:$0x1]  ;;  %s1089_s11 = smov 12  }
  0x18   : > { %990 = vmatpush3.msra.mxu0 %v648_v11  ;;  %v612_v14 = vrot.slane %v584_v13, 1  ;;  %603 = vrot.lane.b32.xlu1 %v583_v12, %s1089_s11  ;;  %v611_v15 = vrot.slane %v583_v12, 1  ;;  %v585_v16 = vld [vmem:[%s543_s16] sm:$0xff]  ;;  %s963_s20 = sshll.u32 %s1279_s19, 1  ;;  %s1090_s22 = smov 20  }
  0x19   : > { %v598_v10 = vsel %vm595_vm1, %v596_v6, %v597_v7  ;;  %s554_s21 = sadd.s32 %s1180_s14, %s963_s20  ;;  %s1092_s19 = smov 28  }
  0x1a   : > { %599 = vrot.lane.b32.xlu0 %v598_v10, %s1087_s13  ;;  %v613_v17 = vsel %vm595_vm1, %v611_v15, %v612_v14  ;;  %s964_s23 = sshll.u32 %s554_s21, 3  ;;  %s1093_s14 = smov 24  }
  0x1b   : > { %s556_s13 = scalar_lea.vmem %s1257_s4, %s964_s23  ;;  %s569_s17 = scalar_lea.vmem %s1258_s5, %s964_s23 }
  0x1c   : > { %607 = vrot.lane.b32.xlu1 %v585_v16, %s1091_s24  ;;  %v586_v18 = vld [vmem:[%s556_s13] sm:$0xff]  ;;  %v587_v19 = vld [vmem:[%s556_s13 + $0x8] sm:$0x1]  ;;  %s1094_s16 = smov 32   ;;  %s1281_s27 = smov (!%p574_p9, %s1067_s27), 7 }
  0x1d   : > { %v588_v20 = vld [vmem:[%s569_s17] sm:$0xff]  ;;  %v626_v21 = vrot.slane %v586_v18, 1  ;;  %v627_v22 = vrot.slane %v587_v19, 1  ;;  %s968_s18 = sshll.u32 %s1275_s28, 3 }
  0x1e   : > { %614 = vrot.lane.b32.xlu0 %v613_v17, %s1090_s22  ;;  %s577_s11 = sadd.s32 %s968_s18, %s1281_s27 }
  0x1f   : > { %v628_v23 = vsel %vm595_vm1, %v626_v21, %v627_v22  ;;  %s969_s20 = sshll.u32 %s577_s11, 3 }
  0x20   : > { %618 = vrot.lane.b32.xlu1 %v586_v18, %s1093_s14  ;;  %s579_s25 = scalar_lea.vmem %s1261_s8, %s969_s20 }
  0x22   : > { %622 = vrot.lane.b32.xlu0 %v588_v20, %s1092_s19 }
  0x24   : > { %629 = vrot.lane.b32.xlu1 %v628_v23, %s1094_s16 }
  0x88   : > { %v591_v24 = vpop.permute.xlu0 %590 }
  0x89   : > { %v633_v25 = vsel %vm632_vm3, %v1196_v4, %v591_v24 }
  0x8a   : > { %v604_v28 = vpop.permute.xlu1 %603 }
  0x8c   : > { %v600_v26 = vpop.permute.xlu0 %599 }
  0x8d   : > { %v635_v27 = vsel %vm634_vm4, %v633_v25, %v600_v26 }
  0x8e   : > { %v637_v29 = vsel %vm636_vm5, %v635_v27, %v604_v28  ;;  %v608_v31 = vpop.permute.xlu1 %607 }
  0x8f   : > { %v639_v32 = vsel %vm638_vm6, %v637_v29, %v608_v31 }
  0x90   : > { %v615_v30 = vpop.permute.xlu0 %614 }
  0x91   : > { %v641_v33 = vsel %vm640_vm7, %v639_v32, %v615_v30 }
  0x92   : > { %v619_v35 = vpop.permute.xlu1 %618 }
  0x93   : > { %v643_v36 = vsel %vm642_vm8, %v641_v33, %v619_v35 }
  0x94   : > { %v623_v34 = vpop.permute.xlu0 %622 }
  0x95   : > { %v645_v37 = vsel %vm644_vm9, %v643_v36, %v623_v34 }
  0x96   : > { %v630_v38 = vpop.permute.xlu1 %629 }
  0x97   : > { %v647_v39 = vsel %vm646_vm10, %v645_v37, %v630_v38 }
  0x98   : > { %992 = vmatmul.mubr.msk.f32.vlgmr.msra.gmra.mxu0 %vm660_vm11, %v647_v39 }
 0x158   : > { %v734_v41 = vpop.f32.mrf.mxu0 }
 0x159   : > { %v735_v42 = vadd.f32 %v970_v40, %v734_v41 }
 0x15a   : > { %v993_v43 = vpop.f32.mrf.mxu0 }
 0x15b   : > { %738 = vst.msk [vmem:[%s579_s25] sm:$0xff] %vm632_vm3, %v735_v42 }
 0x15c PF: > { %s18_s9 = sadd.s32 1, %s1083_s9   ;;  %s1263_s26 = sld [smem:[#allocation2_spill]] }
 0x15d   : > { %p15_p10 = scmp.ge.s32.totalorder %s18_s9, 18   ;;  %s1264_s27 = smov %s1075_s29 }
 0x15e   : > { %s1265_s28 = smov %s1079_s30  ;;  %s1266_s29 = smov %s1269_s10 }
 0x15f   :  { %17 = sbr.rel (!%p15_p10) target bundleno = 3 (0x3), region = 97 }
 0x162   : > { %s1267_s30 = smov %s1263_s26 }

</bundles_post_ra>
